<compile_context>
chip_gen: v6e
topology: v6e:2x2x1
jax: 0.10.0
libtpu: 0.0.40
codegen_flags: <defaults>
</compile_context>

<pallas_src>
import functools
import math

import jax
import jax.numpy as jnp
from jax.experimental import pallas as pl
from jax.experimental.pallas import tpu as pltpu

_VMEM_LIMIT_BYTES = 48 * 1024 * 1024  # safe on v7x (64 MiB), > default scoped on v5e/v6e


# ----------------------------------------------------------------------------
# In-kernel math helpers
# ----------------------------------------------------------------------------
def _erf_approx(x):
    # Abramowitz & Stegun 7.1.26 rational approximation, |err| < 1.5e-7.
    a1, a2, a3, a4, a5 = 0.254829592, -0.284496736, 1.421413741, -1.453152027, 1.061405429
    p = 0.3275911
    ax = jnp.abs(x)
    t = 1.0 / (1.0 + p * ax)
    poly = ((((a5 * t + a4) * t + a3) * t + a2) * t + a1) * t
    y = 1.0 - poly * jnp.exp(-ax * ax)
    return jnp.where(x >= 0.0, y, -y)


def _gelu_exact(x):
    # Matches torch.nn.functional.gelu (erf-based, non-approximate).
    return 0.5 * x * (1.0 + _erf_approx(x * 0.7071067811865476))


def _round_up(x, m):
    return ((x + m - 1) // m) * m


# ----------------------------------------------------------------------------
# Fused (optional LayerNorm) -> matmul + bias -> (optional GELU) -> (optional residual)
# ----------------------------------------------------------------------------
def _fused_linear_kernel(*refs, ln, gelu, residual, eps, compute_dtype):
    idx = 0
    x_ref = refs[idx]; idx += 1
    if ln:
        g_ref = refs[idx]; bln_ref = refs[idx + 1]; idx += 2
    w_ref = refs[idx]; b_ref = refs[idx + 1]; idx += 2
    if residual:
        r_ref = refs[idx]; idx += 1
    o_ref = refs[idx]

    x = x_ref[...].astype(jnp.float32)
    if ln:
        mu = jnp.mean(x, axis=-1, keepdims=True)
        var = jnp.mean(jnp.square(x - mu), axis=-1, keepdims=True)
        x = (x - mu) * jax.lax.rsqrt(var + eps)
        x = x * g_ref[...].astype(jnp.float32) + bln_ref[...].astype(jnp.float32)

    # MXU matmul in compute_dtype (bf16 in production) with f32 accumulation;
    # weights are already pre-cast host-side so the astype on w is a no-op.
    y = jnp.dot(x.astype(compute_dtype), w_ref[...].astype(compute_dtype),
                preferred_element_type=jnp.float32)
    y = y + b_ref[...].astype(jnp.float32)
    if gelu:
        y = _gelu_exact(y)
    if residual:
        y = y + r_ref[...].astype(jnp.float32)
    o_ref[...] = y.astype(o_ref.dtype)


def _choose_tn(d_out, tn_target):
    """Largest lane-aligned N tile <= tn_target that divides d_out."""
    if d_out <= tn_target:
        return d_out
    t = (tn_target // 128) * 128
    while t >= 128:
        if d_out % t == 0:
            return t
        t -= 128
    # d_out not divisible by 128 at all: fall back to a single full-width tile
    # (full-extent block satisfies the (8,128) rule).
    return d_out


def fused_linear(x2d, w_t, bias, *, ln_params=None, gelu=False, residual=None,
                 eps=1e-6, tm_target=256, tn_target=512, compute_dtype=jnp.float32):
    """y = [LN](x) @ w_t + bias, optionally GELU'd, optionally + residual.

    x2d: (M, D_in); w_t: (D_in, D_out) already transposed & cast to compute_dtype;
    bias: (D_out,); residual: (M, D_out) or None.
    """
    m, d_in = x2d.shape
    d_out = w_t.shape[1]
    out_dtype = x2d.dtype

    # Token tiling: keep tiles sublane-aligned (pad ragged tail host-side, slice off after).
    if m <= tm_target:
        tm = _round_up(m, 8)
        m_pad = tm
    else:
        tm = tm_target                      # multiple of 256 -> fills the MXU M dim
        m_pad = _round_up(m, tm)

    # N (d_out) tiling keeps the weight slab VMEM-bounded for wide layers.
    tn = _choose_tn(d_out, tn_target)

    xp = x2d if m_pad == m else jnp.pad(x2d, ((0, m_pad - m), (0, 0)))
    bias2d = bias.reshape(1, d_out)

    inputs = [xp]
    in_specs = [pl.BlockSpec((tm, d_in), lambda j, i: (i, 0))]
    if ln_params is not None:
        g, b_ln = ln_params
        inputs += [g.reshape(1, d_in), b_ln.reshape(1, d_in)]
        in_specs += [pl.BlockSpec((1, d_in), lambda j, i: (0, 0)),
                     pl.BlockSpec((1, d_in), lambda j, i: (0, 0))]
    inputs += [w_t, bias2d]
    in_specs += [pl.BlockSpec((d_in, tn), lambda j, i: (0, j)),
                 pl.BlockSpec((1, tn), lambda j, i: (0, j))]
    if residual is not None:
        resp = residual if m_pad == m else jnp.pad(residual, ((0, m_pad - m), (0, 0)))
        inputs.append(resp)
        in_specs.append(pl.BlockSpec((tm, tn), lambda j, i: (i, j)))

    kernel = functools.partial(_fused_linear_kernel, ln=ln_params is not None,
                               gelu=gelu, residual=residual is not None, eps=eps,
                               compute_dtype=compute_dtype)

    # Grid order: N tiles outer, token tiles inner -> the (d_in, tn) weight tile stays
    # VMEM-resident while tokens stream through it.
    out = pl.pallas_call(
        kernel,
        out_shape=jax.ShapeDtypeStruct((m_pad, d_out), out_dtype),
        grid_spec=pltpu.PrefetchScalarGridSpec(
            num_scalar_prefetch=0,
            grid=(d_out // tn, m_pad // tm),
            in_specs=in_specs,
            out_specs=pl.BlockSpec((tm, tn), lambda j, i: (i, j)),
        ),
        compiler_params=pltpu.CompilerParams(
            dimension_semantics=("parallel", "parallel"),
            vmem_limit_bytes=_VMEM_LIMIT_BYTES),
    )(*inputs)

    return out[:m] if m_pad != m else out


# ----------------------------------------------------------------------------
# Multi-head self-attention: grid = (batch, head), per-head lane-contiguous blocks
# ----------------------------------------------------------------------------
def _attention_kernel(q_ref, k_ref, v_ref, ctx_ref, probs_ref, *, scale, compute_dtype):
    # q_ref/k_ref/v_ref/ctx_ref: (1, 1, S, Dh); probs_ref: (1, 1, S, S)
    q = q_ref[0, 0].astype(compute_dtype)
    k = k_ref[0, 0].astype(compute_dtype)

    # scores = q @ k^T / sqrt(Dh)  (f32 accumulation)
    s = jax.lax.dot_general(q, k, (((1,), (1,)), ((), ())),
                            preferred_element_type=jnp.float32) * scale      # (S, S)
    s = s - jnp.max(s, axis=-1, keepdims=True)
    p = jnp.exp(s)
    probs = p / jnp.sum(p, axis=-1, keepdims=True)   # exact divide: probs must stay f32-accurate
    probs_ref[0, 0] = probs.astype(probs_ref.dtype)

    ctx = jnp.dot(probs.astype(compute_dtype), v_ref[0, 0].astype(compute_dtype),
                  preferred_element_type=jnp.float32)                         # (S, Dh)
    ctx_ref[0, 0] = ctx.astype(ctx_ref.dtype)


def attention(q, k, v, *, compute_dtype=jnp.float32):
    """q, k, v: (B, H, S, Dh). Returns ctx (B, H, S, Dh), probs (B, H, S, S) in f32."""
    B, H, S, Dh = q.shape
    scale = 1.0 / math.sqrt(Dh)

    kernel = functools.partial(_attention_kernel, scale=scale, compute_dtype=compute_dtype)
    ctx, probs = pl.pallas_call(
        kernel,
        out_shape=(jax.ShapeDtypeStruct((B, H, S, Dh), q.dtype),
                   jax.ShapeDtypeStruct((B, H, S, S), jnp.float32)),
        grid_spec=pltpu.PrefetchScalarGridSpec(
            num_scalar_prefetch=0,
            grid=(B, H),
            in_specs=[pl.BlockSpec((1, 1, S, Dh), lambda b, h: (b, h, 0, 0)),
                      pl.BlockSpec((1, 1, S, Dh), lambda b, h: (b, h, 0, 0)),
                      pl.BlockSpec((1, 1, S, Dh), lambda b, h: (b, h, 0, 0))],
            out_specs=(pl.BlockSpec((1, 1, S, Dh), lambda b, h: (b, h, 0, 0)),
                       pl.BlockSpec((1, 1, S, S), lambda b, h: (b, h, 0, 0))),
        ),
        compiler_params=pltpu.CompilerParams(
            dimension_semantics=("parallel", "parallel"),
            vmem_limit_bytes=_VMEM_LIMIT_BYTES),
    )(q, k, v)
    return ctx, probs


# ----------------------------------------------------------------------------
# One-time parameter prep (concat / transpose / dtype cast done once, off the hot path)
# ----------------------------------------------------------------------------
def prepare_params(params, compute_dtype=jnp.float32):
    return {
        "w_qkv_t": jnp.concatenate([params["wq"], params["wk"], params["wv"]],
                                   axis=0).T.astype(compute_dtype),   # (D, 3D)
        "b_qkv": jnp.concatenate([params["bq"], params["bk"], params["bv"]], axis=0),
        "wo_t": params["wo"].T.astype(compute_dtype),
        "bo": params["bo"],
        "w_fc1_t": params["w_fc1"].T.astype(compute_dtype),
        "b_fc1": params["b_fc1"],
        "w_fc2_t": params["w_fc2"].T.astype(compute_dtype),
        "b_fc2": params["b_fc2"],
        "ln1_g": params["ln1_g"], "ln1_b": params["ln1_b"],
        "ln2_g": params["ln2_g"], "ln2_b": params["ln2_b"],
    }


# ----------------------------------------------------------------------------
# Full Block forward (eval mode: dropout == identity)
# ----------------------------------------------------------------------------
def vit_block_forward(x, prep, num_heads, *, compute_dtype=jnp.float32):
    """x: (B, S, D). Returns (block_output (B,S,D), attention_probs (B,H,S,S))."""
    B, S, D = x.shape
    dh = D // num_heads
    x2 = x.reshape(B * S, D)

    # 1) attention_norm + fused QKV projection
    qkv = fused_linear(x2, prep["w_qkv_t"], prep["b_qkv"],
                       ln_params=(prep["ln1_g"], prep["ln1_b"]),
                       compute_dtype=compute_dtype)                              # (M, 3D)

    # Host-side re-layout to per-head (B, H, S, Dh) so each attention grid step works on
    # lane-contiguous blocks (no 64-lane-offset masked loads/stores inside the kernel).
    qkv5 = qkv.reshape(B, S, 3, num_heads, dh).transpose(2, 0, 3, 1, 4)          # (3,B,H,S,Dh)
    q, k, v = qkv5[0], qkv5[1], qkv5[2]

    # 2) multi-head attention
    ctx, probs = attention(q, k, v, compute_dtype=compute_dtype)                 # (B,H,S,Dh)
    ctx2 = ctx.transpose(0, 2, 1, 3).reshape(B * S, D)

    # 3) out projection + residual
    x_attn = fused_linear(ctx2, prep["wo_t"], prep["bo"], residual=x2,
                          compute_dtype=compute_dtype)                           # (M, D)
    # 4) ffn_norm + FC1 + GELU
    h1 = fused_linear(x_attn, prep["w_fc1_t"], prep["b_fc1"],
                      ln_params=(prep["ln2_g"], prep["ln2_b"]), gelu=True,
                      compute_dtype=compute_dtype)                               # (M, mlp)
    # 5) FC2 + residual
    out = fused_linear(h1, prep["w_fc2_t"], prep["b_fc2"], residual=x_attn,
                       compute_dtype=compute_dtype)                              # (M, D)

    return out.reshape(B, S, D), probs


# ----------------------------------------------------------------------------
# Pure-JAX reference of the exact PyTorch Block forward
# ----------------------------------------------------------------------------
def reference_block(x, p, num_heads):
    def ln(t, g, b):
        mu = t.mean(-1, keepdims=True)
        var = ((t - mu) ** 2).mean(-1, keepdims=True)
        return (t - mu) / jnp.sqrt(var + 1e-6) * g + b

    B, S, D = x.shape
    dh = D // num_heads
    h = x
    y = ln(x, p["ln1_g"], p["ln1_b"])
    q = y @ p["wq"].T + p["bq"]
    k = y @ p["wk"].T + p["bk"]
    v = y @ p["wv"].T + p["bv"]

    def split(t):
        return t.reshape(B, S, num_heads, dh).transpose(0, 2, 1, 3)

    qh, kh, vh = split(q), split(k), split(v)
    scores = qh @ kh.transpose(0, 1, 3, 2) / math.sqrt(dh)
    probs = jax.nn.softmax(scores, axis=-1)
    ctx = (probs @ vh).transpose(0, 2, 1, 3).reshape(B, S, D)
    x1 = ctx @ p["wo"].T + p["bo"] + h
    y2 = ln(x1, p["ln2_g"], p["ln2_b"])
    f1 = jax.nn.gelu(y2 @ p["w_fc1"].T + p["b_fc1"], approximate=False)
    out = f1 @ p["w_fc2"].T + p["b_fc2"] + x1
    return out, probs


if __name__ == "__main__":
    B, S, D, H, MLP = 2, 16, 32, 4, 64
    f32 = jnp.float32
    key = jax.random.PRNGKey(0)
    keys = jax.random.split(key, 18)

    x = jax.random.normal(keys[0], (B, S, D), f32)

    def w(k, o, i):
        return jax.random.normal(k, (o, i), f32) * 0.05

    def b(k, o):
        return jax.random.normal(k, (o,), f32) * 0.05

    params = {
        "ln1_g": 1.0 + 0.1 * jax.random.normal(keys[1], (D,), f32),
        "ln1_b": 0.1 * jax.random.normal(keys[2], (D,), f32),
        "wq": w(keys[3], D, D), "bq": b(keys[4], D),
        "wk": w(keys[5], D, D), "bk": b(keys[6], D),
        "wv": w(keys[7], D, D), "bv": b(keys[8], D),
        "wo": w(keys[9], D, D), "bo": b(keys[10], D),
        "ln2_g": 1.0 + 0.1 * jax.random.normal(keys[11], (D,), f32),
        "ln2_b": 0.1 * jax.random.normal(keys[12], (D,), f32),
        "w_fc1": w(keys[13], MLP, D), "b_fc1": b(keys[14], MLP),
        "w_fc2": w(keys[15], D, MLP), "b_fc2": b(keys[16], D),
    }

    # --- Production-style bf16-MXU run (compile/run check only; no tight tolerance) ---
    prep_bf16 = prepare_params(params, compute_dtype=jnp.bfloat16)
    out_bf16, probs_bf16 = vit_block_forward(x, prep_bf16, num_heads=H,
                                             compute_dtype=jnp.bfloat16)
    out_bf16 = jax.block_until_ready(out_bf16)
    probs_bf16 = jax.block_until_ready(probs_bf16)
    assert out_bf16.shape == (B, S, D)
    assert probs_bf16.shape == (B, H, S, S)

    # --- f32 run, verified against the pure-JAX reference at 1e-4 tolerance ---
    prep_f32 = prepare_params(params, compute_dtype=jnp.float32)
    out, probs = vit_block_forward(x, prep_f32, num_heads=H, compute_dtype=jnp.float32)
    out = jax.block_until_ready(out)
    probs = jax.block_until_ready(probs)

    ref_out, ref_probs = reference_block(x, params, num_heads=H)

    assert out.shape == (B, S, D), out.shape
    assert probs.shape == (B, H, S, S), probs.shape
    assert jnp.allclose(out, ref_out, atol=1e-4, rtol=1e-4), (
        f"output mismatch, max abs err = {jnp.max(jnp.abs(out - ref_out))}")
    assert jnp.allclose(probs, ref_probs, atol=1e-4, rtol=1e-4), (
        f"probs mismatch, max abs err = {jnp.max(jnp.abs(probs - ref_probs))}")

    print("KERNEL_OK")
</pallas_src>

<mosaic_0001>
module attributes {stable_mosaic.version = 11 : i64} {
  func.func @_fused_linear_kernel(%arg0: i32, %arg1: i32, %arg2: memref<32x32xf32, #tpu.memory_space<vmem>>, %arg3: memref<1x32xf32, #tpu.memory_space<vmem>>, %arg4: memref<1x32xf32, #tpu.memory_space<vmem>>, %arg5: memref<32x96xbf16, #tpu.memory_space<vmem>>, %arg6: memref<1x96xf32, #tpu.memory_space<vmem>>, %arg7: memref<32x96xf32, #tpu.memory_space<vmem>>) attributes {dimension_semantics = [#tpu.dimension_semantics<parallel>, #tpu.dimension_semantics<parallel>], iteration_bounds = array<i64: 1, 1>, scalar_prefetch = 0 : i64, scratch_operands = 0 : i64, tpu.core_type = #tpu.core_type<tc>, window_params = [{transform_indices = @transform_0, window_bounds = array<i64: 32, 32>}, {pipeline_mode = #tpu.pipeline_mode<synchronous>, transform_indices = @transform_1, window_bounds = array<i64: 1, 32>}, {pipeline_mode = #tpu.pipeline_mode<synchronous>, transform_indices = @transform_2, window_bounds = array<i64: 1, 32>}, {transform_indices = @transform_3, window_bounds = array<i64: 32, 96>}, {transform_indices = @transform_4, window_bounds = array<i64: 1, 96>}, {transform_indices = @transform_5, window_bounds = array<i64: 32, 96>}]} {
    %c0 = arith.constant 0 : index
    %c0_0 = arith.constant 0 : index
    %0 = vector.load %arg2[%c0, %c0_0] : memref<32x32xf32, #tpu.memory_space<vmem>>, vector<32x32xf32>
    %cst = arith.constant dense<0.000000e+00> : vector<32xf32>
    %1 = vector.multi_reduction <add>, %0, %cst [1] : vector<32x32xf32> to vector<32xf32>
    %2 = vector.shape_cast %1 : vector<32xf32> to vector<32x1xf32>
    %cst_1 = arith.constant 3.200000e+01 : f32
    %3 = vector.broadcast %cst_1 : f32 to vector<32x1xf32>
    %4 = arith.divf %2, %3 : vector<32x1xf32>
    %5 = vector.broadcast %4 : vector<32x1xf32> to vector<32x32xf32>
    %6 = arith.subf %0, %5 : vector<32x32xf32>
    %7 = arith.mulf %6, %6 : vector<32x32xf32>
    %cst_2 = arith.constant dense<0.000000e+00> : vector<32xf32>
    %8 = vector.multi_reduction <add>, %7, %cst_2 [1] : vector<32x32xf32> to vector<32xf32>
    %9 = vector.shape_cast %8 : vector<32xf32> to vector<32x1xf32>
    %cst_3 = arith.constant 3.200000e+01 : f32
    %10 = vector.broadcast %cst_3 : f32 to vector<32x1xf32>
    %11 = arith.divf %9, %10 : vector<32x1xf32>
    %12 = vector.broadcast %4 : vector<32x1xf32> to vector<32x32xf32>
    %13 = arith.subf %0, %12 : vector<32x32xf32>
    %cst_4 = arith.constant 9.99999997E-7 : f32
    %14 = vector.broadcast %cst_4 : f32 to vector<32x1xf32>
    %15 = arith.addf %11, %14 : vector<32x1xf32>
    %16 = math.rsqrt %15 : vector<32x1xf32>
    %17 = vector.broadcast %16 : vector<32x1xf32> to vector<32x32xf32>
    %18 = arith.mulf %13, %17 : vector<32x32xf32>
    %c0_5 = arith.constant 0 : index
    %c0_6 = arith.constant 0 : index
    %19 = vector.load %arg3[%c0_5, %c0_6] : memref<1x32xf32, #tpu.memory_space<vmem>>, vector<1x32xf32>
    %20 = vector.broadcast %19 : vector<1x32xf32> to vector<32x32xf32>
    %21 = arith.mulf %18, %20 : vector<32x32xf32>
    %c0_7 = arith.constant 0 : index
    %c0_8 = arith.constant 0 : index
    %22 = vector.load %arg4[%c0_7, %c0_8] : memref<1x32xf32, #tpu.memory_space<vmem>>, vector<1x32xf32>
    %23 = vector.broadcast %22 : vector<1x32xf32> to vector<32x32xf32>
    %24 = arith.addf %21, %23 : vector<32x32xf32>
    %25 = arith.truncf %24 : vector<32x32xf32> to vector<32x32xbf16>
    %c0_9 = arith.constant 0 : index
    %c0_10 = arith.constant 0 : index
    %26 = vector.load %arg5[%c0_9, %c0_10] : memref<32x96xbf16, #tpu.memory_space<vmem>>, vector<32x96xbf16>
    %cst_11 = arith.constant dense<0.000000e+00> : vector<32x96xf32>
    %27 = tpu.matmul %25, %26, %cst_11 {dimension_numbers = #tpu.dot_dimension_numbers<[1], [0], [0], [1], [0, 0, 1, 1], [], []>} : vector<32x32xbf16>, vector<32x96xbf16>, vector<32x96xf32> -> vector<32x96xf32>
    %c0_12 = arith.constant 0 : index
    %c0_13 = arith.constant 0 : index
    %28 = vector.load %arg6[%c0_12, %c0_13] : memref<1x96xf32, #tpu.memory_space<vmem>>, vector<1x96xf32>
    %29 = vector.broadcast %28 : vector<1x96xf32> to vector<32x96xf32>
    %30 = arith.addf %27, %29 : vector<32x96xf32>
    %c0_14 = arith.constant 0 : index
    %c0_15 = arith.constant 0 : index
    %31 = vector.load %arg7[%c0_14, %c0_15] : memref<32x96xf32, #tpu.memory_space<vmem>>, vector<32x96xf32>
    tpu.vector_store %arg7[%c0_14, %c0_15], %30 {strides = array<i32>} : memref<32x96xf32, #tpu.memory_space<vmem>>, vector<32x96xf32>,
    return
  }
  func.func @transform_0(%arg0: i32, %arg1: i32) -> (i32, i32) {
    %c0_i32 = arith.constant 0 : i32
    %c0_i32_0 = arith.constant 0 : i32
    return %arg1, %c0_i32 : i32, i32
  }
  func.func @transform_1(%arg0: i32, %arg1: i32) -> (i32, i32) {
    %c0_i32 = arith.constant 0 : i32
    %c0_i32_0 = arith.constant 0 : i32
    %c0_i32_1 = arith.constant 0 : i32
    return %c0_i32, %c0_i32_0 : i32, i32
  }
  func.func @transform_2(%arg0: i32, %arg1: i32) -> (i32, i32) {
    %c0_i32 = arith.constant 0 : i32
    %c0_i32_0 = arith.constant 0 : i32
    %c0_i32_1 = arith.constant 0 : i32
    return %c0_i32, %c0_i32_0 : i32, i32
  }
  func.func @transform_3(%arg0: i32, %arg1: i32) -> (i32, i32) {
    %c0_i32 = arith.constant 0 : i32
    %c0_i32_0 = arith.constant 0 : i32
    return %c0_i32, %arg0 : i32, i32
  }
  func.func @transform_4(%arg0: i32, %arg1: i32) -> (i32, i32) {
    %c0_i32 = arith.constant 0 : i32
    %c0_i32_0 = arith.constant 0 : i32
    return %c0_i32, %arg0 : i32, i32
  }
  func.func @transform_5(%arg0: i32, %arg1: i32) -> (i32, i32) {
    %c0_i32 = arith.constant 0 : i32
    return %arg1, %arg0 : i32, i32
  }
}

</mosaic_0001>

<bundles_post_ra>
// kernel: tpu_custom_call.1
= control target key start
LH: loop header
LB: loop body
LE: loop exit
PB: predicated region body
PF: predicated region fallthrough
CT: control target
= control target key end

     0   :  { %10 = vsyncpa [#allocation3], 0  ;;  %s406_s0 = inlined_call_operand.hbm [shape: f32[32,32], index: 0, kind: input, shape index: {}]   ;;  %s407_s1 = inlined_call_operand.vmem [shape: f32[1,32], index: 1, kind: input, shape index: {}]   ;;  %s408_s2 = inlined_call_operand.vmem [shape: f32[1,32], index: 2, kind: input, shape index: {}]   ;;  %s409_s3 = inlined_call_operand.hbm [shape: bf16[32,96], index: 3, kind: input, shape index: {}]   ;;  %s410_s4 = inlined_call_operand.vmem [shape: f32[1,96], index: 4, kind: input, shape index: {}]   ;;  %s411_s5 = inlined_call_operand.hbm [shape: f32[32,96], index: 5, kind: output, shape index: {}]  }
   0x1   :  { %11 = vsyncpa [#allocation6], 0 }
   0x2   :  { %12 = vsyncpa [#allocation4], 0  ;;  %s335_s18 = smov [#allocation2]  }
   0x3   :  { %s18_s19 = sshll.u32 %s335_s18, 4  ;;  %s19_s19 = int_to_ptr.vmem [resolvable:$true] %s18_s19 }
   0x4   :  { %s277_s20 = scalar_lea.vmem %s19_s19, 512  ;;  %p282_p1 = scmp.lt.s32.totalorder %s19_s19, %s19_s19 }
   0x5   :  { %p278_p0 = scmp.ne.s32.totalorder %s19_s19, %s277_s20  ;;  %p283_p2 = scmp.lt.s32.totalorder %s277_s20, %s277_s20 }
   0x7   :  { %p284_p3 = por %p283_p2, %p282_p1 }
   0x9   :  { %p285_p4 = pnand %p284_p3, %p278_p0 }
   0xb   :  { %288 = shalt.err (!%p285_p4)
}
   0xc   :  { %s336_s21 = smov 128   ;;  %s337_s22 = smov 8  }
   0xd   :  { %24 = dma.hbm_to_vmem [thread:$0]  %s406_s0, 512, %s19_s19, [#allocation3], %s336_s21, %s336_s21, %s337_s22  }
   0xe   :  { %s338_s25 = smov [#allocation5]  }
   0xf   :  { %s34_s26 = sshll.u32 %s338_s25, 4  ;;  %s35_s26 = int_to_ptr.vmem [resolvable:$true] %s34_s26 }
  0x10   :  { %s297_s27 = scalar_lea.vmem %s35_s26, 256  ;;  %p302_p6 = scmp.lt.s32.totalorder %s35_s26, %s35_s26 }
  0x11   :  { %p298_p5 = scmp.ne.s32.totalorder %s35_s26, %s297_s27  ;;  %p303_p7 = scmp.lt.s32.totalorder %s297_s27, %s297_s27 }
  0x13   :  { %p304_p8 = por %p303_p7, %p302_p6 }
  0x15   :  { %p305_p9 = pnand %p304_p8, %p298_p5 }
  0x17   :  { %308 = shalt.err (!%p305_p9)
}
  0x18   :  { %s339_s28 = smov 64   ;;  %s340_s29 = smov 4  }
  0x19   :  { %40 = dma.hbm_to_vmem [thread:$0]  %s409_s3, 256, %s35_s26, [#allocation6], %s339_s28, %s339_s28, %s340_s29  }
  0x1a   :  { %329 = dma.done.wait [#allocation3], 512  }
  0x1b   :  { %330 = vsyncadd [#allocation3], 4294966784 }
  0x1c   :  { %331 = dma.done.wait [#allocation6], 256  }
  0x1d   :  { %332 = vsyncadd [#allocation6], 4294967040  ;;  %vm54_vm0 = vcmask 261120   ;;  %v50_v0 = vld [vmem:[#allocation2] sm:$0xff]  ;;  %v52_v1 = vld [vmem:[#allocation2 + $0x10] sm:$0xff]  ;;  %vm210_vm1 = vcmask 785408  }
  0x1e   :  { %v51_v2 = vld [vmem:[#allocation2 + $0x8] sm:$0xff]  ;;  %v55_v3 = vsel %vm54_vm0, %v50_v0, 0.0  ;;  %v61_v4 = vsel %vm54_vm0, %v52_v1, 0.0  ;;  %v53_v5 = vld [vmem:[#allocation2 + $0x18] sm:$0xff]  ;;  %v260_v29 = vld [vmem:[#allocation5] sm:$0xff]  }
  0x1f   :  { %56 = vadd.xlane.f32.xlu0 %v55_v3  ;;  %62 = vadd.xlane.f32.xlu1 %v61_v4  ;;  %v58_v6 = vsel %vm54_vm0, %v51_v2, 0.0  ;;  %v64_v7 = vsel %vm54_vm0, %v53_v5, 0.0  ;;  %v259_v28 = vld [vmem:[#allocation5 + $0x8] sm:$0xff]   ;;  %v233_v44 = vld [vmem:[%s407_s1] ss:$0 sm:$0xff] }
  0x20   :  { %244 = vmatprep.subr.bf16.mxu0 %v259_v28  ;;  %v234_v49 = vld [vmem:[%s408_s2] ss:$0 sm:$0xff]  ;;  %s341_s2 = smov [#allocation7]  }
  0x21   :  { %245 = vmatpush3.bf16.msra.mxu0 %v259_v28  ;;  %v235_v62 = vld [vmem:[%s410_s4] ss:$0 sm:$0xff]  ;;  %s220_s10 = sshll.u32 %s341_s2, 4  ;;  %s221_s10 = int_to_ptr.vmem [resolvable:$true] %s220_s10 }
  0x22   :  { %246 = vmatprep.subr.bf16.mxu0 %v260_v29  ;;  %s309_s11 = scalar_lea.vmem %s221_s10, 512  ;;  %p314_p11 = scmp.lt.s32.totalorder %s221_s10, %s221_s10 }
  0x23   :  { %59 = vadd.xlane.f32.xlu0 %v58_v6  ;;  %65 = vadd.xlane.f32.xlu1 %v64_v7  ;;  %p310_p10 = scmp.ne.s32.totalorder %s221_s10, %s309_s11  ;;  %p315_p12 = scmp.lt.s32.totalorder %s309_s11, %s309_s11 }
  0x25   :  { %247 = vmatpush3.bf16.msra.mxu0 %v260_v29  ;;  %p316_p13 = por %p315_p12, %p314_p11 }
  0x27   :  { %p317_p0 = pnand %p316_p13, %p310_p10 }
  0xa8   :  { %v57_v8 = vpop.xlane.xlu0 %56  ;;  %v63_v9 = vpop.xlane.xlu1 %62 }
  0xa9   :  { %v68_v10 = vmul.f32 0.03125, %v57_v8  ;;  %v70_v11 = vmul.f32 0.03125, %v63_v9 }
  0xab   :  { %v72_v12 = vsub.f32 %v50_v0, %v68_v10  ;;  %v74_v13 = vsub.f32 %v52_v1, %v70_v11 }
  0xac   :  { %v60_v14 = vpop.xlane.xlu0 %59  ;;  %v66_v15 = vpop.xlane.xlu1 %65 }
  0xad   :  { %v69_v16 = vmul.f32 0.03125, %v60_v14  ;;  %v71_v17 = vmul.f32 0.03125, %v66_v15  ;;  %v76_v18 = vmul.f32 %v72_v12, %v72_v12  ;;  %v78_v19 = vmul.f32 %v74_v13, %v74_v13 }
  0xaf   :  { %v73_v20 = vsub.f32 %v51_v2, %v69_v16  ;;  %v75_v21 = vsub.f32 %v53_v5, %v71_v17  ;;  %v80_v22 = vsel %vm54_vm0, %v76_v18, 0.0  ;;  %v86_v23 = vsel %vm54_vm0, %v78_v19, 0.0 }
  0xb0   :  { %81 = vadd.xlane.f32.xlu0 %v80_v22 }
  0xb1   :  { %v77_v24 = vmul.f32 %v73_v20, %v73_v20  ;;  %v79_v25 = vmul.f32 %v75_v21, %v75_v21 }
  0xb3   :  { %v83_v26 = vsel %vm54_vm0, %v77_v24, 0.0  ;;  %v89_v27 = vsel %vm54_vm0, %v79_v25, 0.0 }
  0xb4   :  { %87 = vadd.xlane.f32.xlu0 %v86_v23  ;;  %84 = vadd.xlane.f32.xlu1 %v83_v26 }
  0xb8   :  { %90 = vadd.xlane.f32.xlu1 %v89_v27 }
 0x139   :  { %v82_v30 = vpop.xlane.xlu0 %81 }
 0x13a   :  { %v92_v31 = vmul.f32 0.03125, %v82_v30 }
 0x13c   :  { %v96_v32 = vadd.f32 1e-06, %v92_v31 }
 0x13d   :  { %v85_v33 = vpop.xlane.xlu1 %84  ;;  %v88_v34 = vpop.xlane.xlu0 %87 }
 0x13e   :  { %261 = vrsqrt.f32 %v96_v32  ;;  %v93_v35 = vmul.f32 0.03125, %v85_v33  ;;  %v94_v36 = vmul.f32 0.03125, %v88_v34 }
 0x140   :  { %v97_v37 = vadd.f32 1e-06, %v93_v35  ;;  %v98_v38 = vadd.f32 1e-06, %v94_v36 }
 0x141   :  { %v91_v39 = vpop.xlane.xlu1 %90 }
 0x142   :  { %263 = vrsqrt.f32 %v97_v37  ;;  %v95_v40 = vmul.f32 0.03125, %v91_v39 }
 0x143   :  { %265 = vrsqrt.f32 %v98_v38 }
 0x144   :  { %v99_v41 = vadd.f32 1e-06, %v95_v40 }
 0x146   :  { %267 = vrsqrt.f32 %v99_v41 }
 0x14b   :  { %v262_v42 = vpop.eup %261 }
 0x14c   :  { %v104_v43 = vmul.f32 %v262_v42, %v72_v12 }
 0x14e   :  { %v115_v48 = vmul.f32 %v233_v44, %v104_v43 }
 0x14f   :  { %v264_v45 = vpop.eup %263 }
 0x150   :  { %v266_v46 = vpop.eup %265  ;;  %v105_v47 = vmul.f32 %v264_v45, %v73_v20  ;;  %v126_v53 = vadd.f32 %v234_v49, %v115_v48 }
 0x151   :  { %v106_v50 = vmul.f32 %v266_v46, %v74_v13 }
 0x152   :  { %v116_v51 = vmul.f32 %v233_v44, %v105_v47 }
 0x153   :  { %v268_v52 = vpop.eup %267  ;;  %v117_v56 = vmul.f32 %v233_v44, %v106_v50 }
 0x154   :  { %v127_v54 = vadd.f32 %v234_v49, %v116_v51  ;;  %v107_v55 = vmul.f32 %v268_v52, %v75_v21 }
 0x155   :  { %v128_v59 = vadd.f32 %v234_v49, %v117_v56 }
 0x156   :  { %v130_v57 = vpack.c.bf16 %v127_v54, %v126_v53  ;;  %v118_v58 = vmul.f32 %v233_v44, %v107_v55 }
 0x158   :  { %248 = vmatprep.mubr.msk.bf16.mxu0 %vm54_vm0, %v130_v57  ;;  %v129_v60 = vadd.f32 %v234_v49, %v118_v58 }
 0x15a   :  { %v131_v61 = vpack.c.bf16 %v129_v60, %v128_v59 }
 0x15c   :  { %249 = vmatmul.mubr.msk.bf16.vlgmr.msra.gmra.mxu0 %vm54_vm0, %v131_v61 }
 0x21c   :  { %v250_v63 = vpop.f32.mrf.mxu0 }
 0x21d   :  { %v204_v0 = vadd.f32 %v250_v63, %v235_v62 }
 0x21e   :  { %v195_v1 = vpop.f32.mrf.mxu0 }
 0x21f   :  { %213 = vst.msk [vmem:[#allocation7 + $0x10] sm:$0xff] %vm210_vm1, %v204_v0  ;;  %v196_v2 = vadd.f32 %v235_v62, %v195_v1 }
 0x220   :  { %v251_v3 = vpop.f32.mrf.mxu0 }
 0x221   :  { %211 = vst.msk [vmem:[#allocation7] sm:$0xff] %vm210_vm1, %v196_v2  ;;  %v207_v4 = vadd.f32 %v251_v3, %v235_v62 }
 0x222   :  { %v198_v5 = vpop.f32.mrf.mxu0 }
 0x223   :  { %214 = vst.msk [vmem:[#allocation7 + $0x18] sm:$0xff] %vm210_vm1, %v207_v4  ;;  %v199_v6 = vadd.f32 %v235_v62, %v198_v5 }
 0x225   :  { %212 = vst.msk [vmem:[#allocation7 + $0x8] sm:$0xff] %vm210_vm1, %v199_v6 }
 0x226   :  { %320 = shalt.err (!%p317_p0)
}
 0x227   :  { %226 = dma.vmem_to_hbm [thread:$0]  %s221_s10, 512, %s411_s5, [#allocation4], %s336_s21, %s336_s21, %s337_s22  }
 0x228   :  { %333 = dma.done.wait [#allocation4], 512  }
 0x229   :  { %334 = vsyncadd [#allocation4], 4294966784 }
 0x22a   :  { %230 = vsyncpa [#allocation3], 1 }
 0x22b   :  { %231 = vsyncpa [#allocation6], 1 }
 0x22c   :  { %232 = vsyncpa [#allocation4], 1 }

</bundles_post_ra>
